<compile_context>
chip_gen: v5e
topology: v5e:2x2
jax: 0.10.0
libtpu: 0.0.40
codegen_flags: <defaults>
</compile_context>

<pallas_src>
import math
import jax
import jax.numpy as jnp
from jax.experimental import pallas as pl
from jax.experimental.pallas import tpu as pltpu


def conv_multihead_target_att_sent(x, w_k, b_k, w_v, b_v, target, *, multihead_cnt):
    """Pallas implementation of ConvMultiheadTargetAttSent.forward.

    x        : (B, D, L)  float32 (Conv1d NCL layout)
    w_k, w_v : (D, D, K)  Conv1d weights of convs[0] (keys) / convs[1] (values)
    b_k, b_v : (D,)       Conv1d biases
    target   : (D, 4)
    returns  : (sentiment_vec (B, D, 4), aspect_vec (4, D))
    """
    B, D, L = x.shape
    K = w_k.shape[-1]
    H = multihead_cnt
    assert D % H == 0
    Dh = D // H
    KD1 = K * D + 1
    scale = 1.0 / math.sqrt(D)
    f32 = jnp.float32

    # ---------------- wrapper-side layout plumbing (no compute) ----------------
    # im2col of the padded input: x_col[b, k*D + i, l] = x_pad[b, i, l + k],
    # plus a trailing ones row that carries the conv biases.
    x_pad = jnp.pad(x.astype(f32), ((0, 0), (0, 0), (1, 1)))        # (B, D, L+2)
    x_col = jnp.concatenate(
        [x_pad[:, :, k:k + L] for k in range(K)]
        + [jnp.ones((B, 1, L), f32)], axis=1)                       # (B, K*D+1, L)

    # Stacked conv weights: rows [0:D) = keys conv, [D:2D) = values conv;
    # column k*D + i = w[o, i, k]; last column = bias.
    def conv_as_matrix(w, b):
        wm = jnp.transpose(w, (0, 2, 1)).reshape(D, K * D)          # (D, K*D)
        return jnp.concatenate([wm, b[:, None]], axis=1).astype(f32)

    w_kv = jnp.concatenate([conv_as_matrix(w_k, b_k),
                            conv_as_matrix(w_v, b_v)], axis=0)      # (2D, K*D+1)

    # Block-diagonal target: row 4h+q is target[:, q] restricted to head h's
    # channel block, so ONE (4H, D) @ (D, L) matmul yields every head's scores.
    head_of_row = jnp.arange(4 * H) // 4                            # (4H,)
    head_of_col = jnp.arange(D) // Dh                               # (D,)
    blk_mask = (head_of_row[:, None] == head_of_col[None, :]).astype(f32)  # (4H, D)
    tgt_bd = jnp.tile(target.T.astype(f32), (H, 1)) * blk_mask      # (4H, D)

    # Reducer that collapses the H diagonal blocks of the masked (4H, D)
    # context matrix into the final lane-dense (4, D) per-batch output.
    reduce_q = (jnp.arange(4)[:, None] == (jnp.arange(4 * H)[None, :] % 4)
                ).astype(f32)                                       # (4, 4H)

    # ------------------------------- kernel -----------------------------------
    def kernel(xcol_ref, wkv_ref, tgt_ref, mask_ref, red_ref, out_ref):
        xcol = xcol_ref[0]                                          # (K*D+1, L)

        # Fused keys+values conv (+bias) as one MXU matmul, then ELU(alpha=1).
        kv = jnp.dot(wkv_ref[...], xcol,
                     preferred_element_type=jnp.float32)            # (2D, L)
        # Clamp so the unselected exp branch cannot overflow; exp(z)-1 on the
        # clamped z matches torch's expm1-based ELU to ~1e-7 in f32.
        kv = jnp.where(kv > 0, kv, jnp.exp(jnp.minimum(kv, 0.0)) - 1.0)
        k_h = kv[:D]                                                # (D, L)
        v_h = kv[D:]                                                # (D, L)

        # All heads' attention scores in one matmul (block-diagonal target).
        scores = jnp.dot(tgt_ref[...], k_h,
                         preferred_element_type=jnp.float32) * scale  # (4H, L)
        scores = scores - jnp.max(scores, axis=-1, keepdims=True)
        p = jnp.exp(scores)
        denom = jnp.sum(p, axis=-1, keepdims=True)
        p = p * pl.reciprocal(denom, approx=True)                   # softmax over L

        # All heads' context: ctx[4h+q, d] = sum_l p[4h+q, l] * v_h[d, l]
        ctx = jax.lax.dot_general(
            p, v_h, (((1,), (1,)), ((), ())),
            preferred_element_type=jnp.float32)                     # (4H, D)

        # Keep each row's own head block, then collapse the H blocks -> (4, D).
        out = jnp.dot(red_ref[...], ctx * mask_ref[...],
                      preferred_element_type=jnp.float32)           # (4, D)
        out_ref[0] = out.astype(out_ref.dtype)

    out = pl.pallas_call(
        kernel,
        out_shape=jax.ShapeDtypeStruct((B, 4, D), f32),
        grid=(B,),
        in_specs=[
            pl.BlockSpec((1, KD1, L), lambda b: (b, 0, 0)),   # per-batch im2col
            pl.BlockSpec((2 * D, KD1), lambda b: (0, 0)),     # resident conv weights
            pl.BlockSpec((4 * H, D), lambda b: (0, 0)),       # resident block-diag target
            pl.BlockSpec((4 * H, D), lambda b: (0, 0)),       # resident block mask
            pl.BlockSpec((4, 4 * H), lambda b: (0, 0)),       # resident head reducer
        ],
        out_specs=pl.BlockSpec((1, 4, D), lambda b: (b, 0, 0)),
        compiler_params=pltpu.CompilerParams(
            dimension_semantics=("parallel",)),
    )(x_col, w_kv, tgt_bd, blk_mask, reduce_q)

    sentiment_vec = jnp.transpose(out, (0, 2, 1))      # (B, D, 4)
    aspect_vec = target.T                              # (4, D)
    return sentiment_vec, aspect_vec


def _ref_forward(x, conv_ws, conv_bs, target, multihead_cnt):
    """Pure-JAX reference mirroring the PyTorch forward."""
    B, D, L = x.shape
    H = multihead_cnt
    Dh = D // H

    def conv1d(w, b):
        xp = jnp.pad(x, ((0, 0), (0, 0), (1, 1)))
        out = jnp.broadcast_to(b[None, :, None], (B, D, L))
        for dk in range(w.shape[-1]):
            out = out + jnp.einsum('oi,bil->bol', w[:, :, dk], xp[:, :, dk:dk + L],
                                   precision=jax.lax.Precision.HIGHEST)
        return out

    k = jax.nn.elu(conv1d(conv_ws[0], conv_bs[0]))   # only convs[0]/[1] reach outputs
    v = jax.nn.elu(conv1d(conv_ws[1], conv_bs[1]))
    q = jnp.broadcast_to(target, (B, D, 4))
    outs = []
    for h in range(H):
        sl = slice(h * Dh, (h + 1) * Dh)
        s = jnp.einsum('bdq,bdl->bql', q[:, sl], k[:, sl],
                       precision=jax.lax.Precision.HIGHEST) / math.sqrt(D)
        s = jax.nn.softmax(s, axis=2)
        outs.append(jnp.einsum('bql,bdl->bdq', s, v[:, sl],
                               precision=jax.lax.Precision.HIGHEST))
    return jnp.concatenate(outs, axis=1), target.T


if __name__ == "__main__":
    B, D, L, K, H = 2, 40, 16, 3, 10   # input_dim=40, kernel_dim=3, multihead_cnt=10
    CONV_CNT = 6

    key = jax.random.PRNGKey(0)
    kx, kt, *kc = jax.random.split(key, 2 + 2 * CONV_CNT)

    x = jax.random.normal(kx, (B, D, L), jnp.float32)

    # Deterministic parameter init mirroring the module's __init__:
    #   conv weights ~ xavier_normal, conv biases ~ default Conv1d uniform,
    #   target ~ U(-1/sqrt(4), 1/sqrt(4)).
    xavier_std = math.sqrt(2.0 / (D * K + D * K))
    bias_bound = 1.0 / math.sqrt(D * K)
    conv_ws = [xavier_std * jax.random.normal(kc[2 * i], (D, D, K), jnp.float32)
               for i in range(CONV_CNT)]
    conv_bs = [jax.random.uniform(kc[2 * i + 1], (D,), jnp.float32,
                                  -bias_bound, bias_bound)
               for i in range(CONV_CNT)]
    target = jax.random.uniform(kt, (D, 4), jnp.float32, -0.5, 0.5)

    sent, aspect = conv_multihead_target_att_sent(
        x, conv_ws[0], conv_bs[0], conv_ws[1], conv_bs[1], target,
        multihead_cnt=H)
    jax.block_until_ready((sent, aspect))

    sent_ref, aspect_ref = _ref_forward(x, conv_ws, conv_bs, target, H)
    assert sent.shape == (B, D, 4) and aspect.shape == (4, D)
    assert jnp.allclose(sent, sent_ref, atol=2e-3, rtol=2e-3)
    assert jnp.allclose(aspect, aspect_ref)
    print("KERNEL_OK")
</pallas_src>

<mosaic_0001>
module attributes {stable_mosaic.version = 11 : i64} {
  func.func @kernel(%arg0: i32, %arg1: memref<1x121x16xf32, #tpu.memory_space<vmem>>, %arg2: memref<80x121xf32, #tpu.memory_space<vmem>>, %arg3: memref<40x40xf32, #tpu.memory_space<vmem>>, %arg4: memref<40x40xf32, #tpu.memory_space<vmem>>, %arg5: memref<4x40xf32, #tpu.memory_space<vmem>>, %arg6: memref<1x4x40xf32, #tpu.memory_space<vmem>>) attributes {dimension_semantics = [#tpu.dimension_semantics<parallel>], iteration_bounds = array<i64: 2>, scalar_prefetch = 0 : i64, scratch_operands = 0 : i64, tpu.core_type = #tpu.core_type<tc>, window_params = [{transform_indices = @transform_0, window_bounds = array<i64: 1, 121, 16>}, {pipeline_mode = #tpu.pipeline_mode<synchronous>, transform_indices = @transform_1, window_bounds = array<i64: 80, 121>}, {pipeline_mode = #tpu.pipeline_mode<synchronous>, transform_indices = @transform_2, window_bounds = array<i64: 40, 40>}, {pipeline_mode = #tpu.pipeline_mode<synchronous>, transform_indices = @transform_3, window_bounds = array<i64: 40, 40>}, {pipeline_mode = #tpu.pipeline_mode<synchronous>, transform_indices = @transform_4, window_bounds = array<i64: 4, 40>}, {transform_indices = @transform_5, window_bounds = array<i64: 1, 4, 40>}]} {
    %c0 = arith.constant 0 : index
    %c0_0 = arith.constant 0 : index
    %c0_1 = arith.constant 0 : index
    %0 = vector.load %arg1[%c0, %c0_0, %c0_1] : memref<1x121x16xf32, #tpu.memory_space<vmem>>, vector<1x121x16xf32>
    %1 = vector.shape_cast %0 : vector<1x121x16xf32> to vector<121x16xf32>
    %c0_2 = arith.constant 0 : index
    %c0_3 = arith.constant 0 : index
    %2 = vector.load %arg2[%c0_2, %c0_3] : memref<80x121xf32, #tpu.memory_space<vmem>>, vector<80x121xf32>
    %cst = arith.constant dense<0.000000e+00> : vector<80x16xf32>
    %3 = tpu.matmul %2, %1, %cst {dimension_numbers = #tpu.dot_dimension_numbers<[1], [0], [0], [1], [0, 0, 1, 1], [], []>} : vector<80x121xf32>, vector<121x16xf32>, vector<80x16xf32> -> vector<80x16xf32>
    %cst_4 = arith.constant 0.000000e+00 : f32
    %4 = vector.broadcast %cst_4 : f32 to vector<80x16xf32>
    %5 = arith.cmpf ogt, %3, %4 : vector<80x16xf32>
    %cst_5 = arith.constant 0.000000e+00 : f32
    %6 = vector.broadcast %cst_5 : f32 to vector<80x16xf32>
    %7 = arith.minimumf %3, %6 : vector<80x16xf32>
    %8 = math.exp %7 : vector<80x16xf32>
    %cst_6 = arith.constant 1.000000e+00 : f32
    %9 = vector.broadcast %cst_6 : f32 to vector<80x16xf32>
    %10 = arith.subf %8, %9 : vector<80x16xf32>
    %11 = arith.select %5, %3, %10 : vector<80x16xi1>, vector<80x16xf32>
    %12 = vector.extract_strided_slice %11 {offsets = [0, 0], sizes = [40, 16], strides = [1, 1]} : vector<80x16xf32> to vector<40x16xf32>
    %13 = vector.extract_strided_slice %11 {offsets = [40, 0], sizes = [40, 16], strides = [1, 1]} : vector<80x16xf32> to vector<40x16xf32>
    %c0_7 = arith.constant 0 : index
    %c0_8 = arith.constant 0 : index
    %14 = vector.load %arg3[%c0_7, %c0_8] : memref<40x40xf32, #tpu.memory_space<vmem>>, vector<40x40xf32>
    %cst_9 = arith.constant dense<0.000000e+00> : vector<40x16xf32>
    %15 = tpu.matmul %14, %12, %cst_9 {dimension_numbers = #tpu.dot_dimension_numbers<[1], [0], [0], [1], [0, 0, 1, 1], [], []>} : vector<40x40xf32>, vector<40x16xf32>, vector<40x16xf32> -> vector<40x16xf32>
    %cst_10 = arith.constant 0.158113882 : f32
    %16 = vector.broadcast %cst_10 : f32 to vector<40x16xf32>
    %17 = arith.mulf %15, %16 : vector<40x16xf32>
    %cst_11 = arith.constant dense<0xFF800000> : vector<40xf32>
    %18 = vector.multi_reduction <maximumf>, %17, %cst_11 [1] : vector<40x16xf32> to vector<40xf32>
    %19 = vector.shape_cast %18 : vector<40xf32> to vector<40x1xf32>
    %20 = vector.broadcast %19 : vector<40x1xf32> to vector<40x16xf32>
    %21 = arith.subf %17, %20 : vector<40x16xf32>
    %22 = math.exp %21 : vector<40x16xf32>
    %cst_12 = arith.constant dense<0.000000e+00> : vector<40xf32>
    %23 = vector.multi_reduction <add>, %22, %cst_12 [1] : vector<40x16xf32> to vector<40xf32>
    %24 = vector.shape_cast %23 : vector<40xf32> to vector<40x1xf32>
    %25 = tpu.reciprocal %24 {approx = true} : vector<40x1xf32> -> vector<40x1xf32>
    %26 = vector.broadcast %25 : vector<40x1xf32> to vector<40x16xf32>
    %27 = arith.mulf %22, %26 : vector<40x16xf32>
    %cst_13 = arith.constant dense<0.000000e+00> : vector<40x40xf32>
    %28 = tpu.matmul %27, %13, %cst_13 {dimension_numbers = #tpu.dot_dimension_numbers<[1], [1], [0], [0], [0, 0, 1, 0], [], []>} : vector<40x16xf32>, vector<40x16xf32>, vector<40x40xf32> -> vector<40x40xf32>
    %c0_14 = arith.constant 0 : index
    %c0_15 = arith.constant 0 : index
    %29 = vector.load %arg5[%c0_14, %c0_15] : memref<4x40xf32, #tpu.memory_space<vmem>>, vector<4x40xf32>
    %c0_16 = arith.constant 0 : index
    %c0_17 = arith.constant 0 : index
    %30 = vector.load %arg4[%c0_16, %c0_17] : memref<40x40xf32, #tpu.memory_space<vmem>>, vector<40x40xf32>
    %31 = arith.mulf %28, %30 : vector<40x40xf32>
    %cst_18 = arith.constant dense<0.000000e+00> : vector<4x40xf32>
    %32 = tpu.matmul %29, %31, %cst_18 {dimension_numbers = #tpu.dot_dimension_numbers<[1], [0], [0], [1], [0, 0, 1, 1], [], []>} : vector<4x40xf32>, vector<40x40xf32>, vector<4x40xf32> -> vector<4x40xf32>
    %c0_19 = arith.constant 0 : index
    %c0_20 = arith.constant 0 : index
    %c0_21 = arith.constant 0 : index
    %33 = vector.load %arg6[%c0_19, %c0_20, %c0_21] : memref<1x4x40xf32, #tpu.memory_space<vmem>>, vector<1x4x40xf32>
    %34 = vector.shape_cast %33 : vector<1x4x40xf32> to vector<4x40xf32>
    %35 = vector.shape_cast %32 : vector<4x40xf32> to vector<1x4x40xf32>
    tpu.vector_store %arg6[%c0_19, %c0_20, %c0_21], %35 {strides = array<i32>} : memref<1x4x40xf32, #tpu.memory_space<vmem>>, vector<1x4x40xf32>,
    return
  }
  func.func @transform_0(%arg0: i32) -> (i32, i32, i32) {
    %c0_i32 = arith.constant 0 : i32
    %c0_i32_0 = arith.constant 0 : i32
    %c0_i32_1 = arith.constant 0 : i32
    return %arg0, %c0_i32, %c0_i32_0 : i32, i32, i32
  }
  func.func @transform_1(%arg0: i32) -> (i32, i32) {
    %c0_i32 = arith.constant 0 : i32
    %c0_i32_0 = arith.constant 0 : i32
    %c0_i32_1 = arith.constant 0 : i32
    return %c0_i32, %c0_i32_0 : i32, i32
  }
  func.func @transform_2(%arg0: i32) -> (i32, i32) {
    %c0_i32 = arith.constant 0 : i32
    %c0_i32_0 = arith.constant 0 : i32
    %c0_i32_1 = arith.constant 0 : i32
    return %c0_i32, %c0_i32_0 : i32, i32
  }
  func.func @transform_3(%arg0: i32) -> (i32, i32) {
    %c0_i32 = arith.constant 0 : i32
    %c0_i32_0 = arith.constant 0 : i32
    %c0_i32_1 = arith.constant 0 : i32
    return %c0_i32, %c0_i32_0 : i32, i32
  }
  func.func @transform_4(%arg0: i32) -> (i32, i32) {
    %c0_i32 = arith.constant 0 : i32
    %c0_i32_0 = arith.constant 0 : i32
    %c0_i32_1 = arith.constant 0 : i32
    return %c0_i32, %c0_i32_0 : i32, i32
  }
  func.func @transform_5(%arg0: i32) -> (i32, i32, i32) {
    %c0_i32 = arith.constant 0 : i32
    %c0_i32_0 = arith.constant 0 : i32
    %c0_i32_1 = arith.constant 0 : i32
    return %arg0, %c0_i32, %c0_i32_0 : i32, i32, i32
  }
}

</mosaic_0001>

<bundles_post_ra>
// kernel: tpu_custom_call.1
= control target key start
LH: loop header
LB: loop body
LE: loop exit
PB: predicated region body
PF: predicated region fallthrough
CT: control target
= control target key end

     0   :  { %10 = vsyncpa [#allocation3], 0  ;;  %s1136_s0 = inlined_call_operand.vmem [shape: f32[2,121,16], index: 0, kind: input, shape index: {}]   ;;  %s1137_s1 = inlined_call_operand.vmem [shape: f32[80,121], index: 1, kind: input, shape index: {}]   ;;  %s1138_s2 = inlined_call_operand.vmem [shape: f32[40,40], index: 2, kind: input, shape index: {}]   ;;  %s1139_s3 = inlined_call_operand.vmem [shape: f32[40,40], index: 3, kind: input, shape index: {}]   ;;  %s1140_s4 = inlined_call_operand.vmem [shape: f32[4,40], index: 4, kind: input, shape index: {}]   ;;  %s1141_s5 = inlined_call_operand.hbm [shape: f32[2,4,40], index: 5, kind: output, shape index: {}]  }
   0x1   :  { %12 = vsyncpa [#allocation3 + $0x1], 0  ;;  %s916_s18 = smov 0   ;;  %s918_s19 = smov 0  }
   0x2   :  { %s920_s20 = smov 0   ;;  %s922_s21 = smov 0  }
   0x3 LB: > { %s937_s22 = sadd.s32 4294967295, %s884_s21   ;;  %s678_s23 = sadd.s32 4294967294, %s884_s21   ;;  %s884_s21 = sphi %s922_s21, %s1147_s21   ;;  %s880_s20 = sphi %s920_s20, %s1146_s20   ;;  %s876_s19 = sphi %s918_s19, %s1145_s19   ;;  %s872_s18 = sphi %s916_s18, %s1144_s18  }
   0x4   : > { %s941_s24 = sadd.s32 1, %s884_s21   ;;  %s135_s25 = sadd.s32 1, %s880_s20 }
   0x5   : > { %s132_s26 = ssub.s32 %s884_s21, %s941_s24  ;;  %p145_p0 = scmp.ne.s32.totalorder %s880_s20, %s876_s19 }
   0x6   : > { %p133_p1 = scmp.eq.s32.totalorder %s132_s26, 0  ;;  %p146_p2 = scmp.eq.s32.totalorder %s937_s22, 1 }
   0x7   : > { %p151_p3 = scmp.ne.s32.totalorder %s876_s19, %s872_s18  ;;  %p152_p4 = scmp.eq.s32.totalorder %s678_s23, 1 }
   0x8   : > { %s952_s27 = scalar_select %p133_p1, %s880_s20, %s135_s25  }
   0x9   : > { %p954_p5 = por %p146_p2, %p145_p0  ;;  %p958_p6 = por %p152_p4, %p151_p3 }
   0xa   : > { %p681_p7 = scmp.ge.s32.totalorder %s884_s21, 1  ;;  %p190_p8 = scmp.lt.s32.totalorder %s884_s21, 3 }
   0xc   : > { %p191_p9 = pnand %p681_p7, %p190_p8 }
   0xd   : > { %p218_p10 = scmp.lt.s32.totalorder (!%p191_p9), %s937_s22, 1  ;;  %s215_s26 = sand.u32 (!%p191_p9), 1, %s876_s19  }
   0xe   : > { %194 = sbr.rel (%p191_p9) target bundleno = 922 (0x39a), region = 40  ;;  %s604_s13 = scalar_lea.sflag (!%p191_p9), [#allocation3], %s215_s26 }
   0xf   : > { %s842_s17 = scalar_lea.hbm (!%p191_p9), %s1141_s5, 8 }
  0x13   : > { %s219_s30 = scalar_select %p218_p10, %s937_s22, 1  ;;  %vm280_vm0 = vcmask 1040384   ;;  %v239_v16 = vld [vmem:[%s1137_s1] sm:$0xff]  ;;  %vm249_vm1 = vcmask 990208   ;;  %v240_v17 = vld [vmem:[%s1137_s1 + $0x8] sm:$0xff]  ;;  %v241_v18 = vld [vmem:[%s1137_s1 + $0x10] sm:$0xff] }
  0x14   : > { %v242_v19 = vld [vmem:[%s1137_s1 + $0x18] sm:$0xff]  ;;  %v243_v20 = vld [vmem:[%s1137_s1 + $0x20] sm:$0xff]  ;;  %vm396_vm7 = vcmask 326656   ;;  %v244_v52 = vld [vmem:[%s1137_s1 + $0x28] sm:$0xff]  ;;  %vm449_vm8 = vcmask 130048   ;;  %vm601_vm14 = vcmask 322560  }
  0x15   : > { %s726_s6 = sshll.u32 %s219_s30, 7  ;;  %v391_v50 = vld [vmem:[%s1138_s2] sm:$0xff]  ;;  %v392_v53 = vld [vmem:[%s1138_s2 + $0x8] sm:$0xff]  ;;  %v393_v54 = vld [vmem:[%s1138_s2 + $0x10] sm:$0xff]  ;;  %s682_s30 = sshll.u32 %s215_s26, 2 }
  0x16   : > { %s969_s9 = scalar_lea.vmem %s1136_s0, %s726_s6  ;;  %v394_v55 = vld [vmem:[%s1138_s2 + $0x18] sm:$0xff]  ;;  %v395_v56 = vld [vmem:[%s1138_s2 + $0x20] sm:$0xff]  ;;  %v245_v57 = vld [vmem:[%s1137_s1 + $0x30] sm:$0xff]  ;;  %s723_s6 = sshll.u32 %s937_s22, 2 }
  0x17   : > { %v238_v0 = vld [vmem:[%s969_s9 + $0x78] sm:$0x1]  ;;  %v237_v1 = vld [vmem:[%s969_s9 + $0x70] sm:$0xff]  ;;  %v236_v2 = vld [vmem:[%s969_s9 + $0x68] sm:$0xff]  ;;  %s217_s10 = scalar_lea.vmem [#allocation2], %s682_s30 }
  0x18   : > { %685 = vmatpush.msk.msra.mxu0 %vm280_vm0, %v238_v0  ;;  %727 = vmatpush.msk.msra.mxu3 %vm280_vm0, %v238_v0  ;;  %v235_v3 = vld [vmem:[%s969_s9 + $0x60] sm:$0xff]  ;;  %v234_v4 = vld [vmem:[%s969_s9 + $0x58] sm:$0xff]  ;;  %v233_v5 = vld [vmem:[%s969_s9 + $0x50] sm:$0xff]  ;;  %s616_s11 = sshll.u32 %s217_s10, 4  ;;  %s617_s11 = int_to_ptr.vmem [resolvable:$true] %s616_s11 }
  0x19   : > { %v232_v6 = vld [vmem:[%s969_s9 + $0x48] sm:$0xff]  ;;  %v231_v7 = vld [vmem:[%s969_s9 + $0x40] sm:$0xff]  ;;  %v230_v8 = vld [vmem:[%s969_s9 + $0x38] sm:$0xff] }
  0x1a   : > { %285 = vmatpush.msra.mxu0 %v237_v1  ;;  %728 = vmatpush.msra.mxu3 %v237_v1  ;;  %v229_v9 = vld [vmem:[%s969_s9 + $0x30] sm:$0xff]  ;;  %v228_v10 = vld [vmem:[%s969_s9 + $0x28] sm:$0xff]  ;;  %v227_v11 = vld [vmem:[%s969_s9 + $0x20] sm:$0xff] }
  0x1b   : > { %v226_v12 = vld [vmem:[%s969_s9 + $0x18] sm:$0xff]  ;;  %v225_v13 = vld [vmem:[%s969_s9 + $0x10] sm:$0xff]  ;;  %v224_v14 = vld [vmem:[%s969_s9 + $0x8] sm:$0xff] }
  0x1c   : > { %286 = vmatpush.msra.mxu0 %v236_v2  ;;  %729 = vmatpush.msra.mxu3 %v236_v2  ;;  %v223_v15 = vld [vmem:[%s969_s9] sm:$0xff]  ;;  %v246_v58 = vld [vmem:[%s1137_s1 + $0x38] sm:$0xff]  ;;  %v248_v60 = vld [vmem:[%s1137_s1 + $0x48] sm:$0xff]  ;;  %s614_s9 = scalar_lea.hbm %s1141_s5, %s723_s6 }
  0x1d   : > { %v247_v59 = vld [vmem:[%s1137_s1 + $0x40] sm:$0xff]  ;;  %s618_s12 = sshll.u32 %s614_s9, 4  ;;  %s619_s12 = int_to_ptr.hbm [resolvable:$true] %s618_s12 }
  0x1e   : > { %287 = vmatpush.msra.mxu0 %v235_v3  ;;  %730 = vmatpush.msra.mxu3 %v235_v3  ;;  %s836_s14 = sshra.s32 %s619_s12, 4  ;;  %s837_s14 = int_to_ptr.hbm [resolvable:$true] %s836_s14 }
  0x1f   : > { %s838_s15 = scalar_lea.hbm %s837_s14, 4  ;;  %p843_p0 = scmp.lt.s32.totalorder %s837_s14, %s1141_s5 }
  0x20   : > { %288 = vmatpush.msra.mxu0 %v234_v4  ;;  %731 = vmatpush.msra.mxu3 %v234_v4  ;;  %p839_p11 = scmp.ne.s32.totalorder %s837_s14, %s838_s15  ;;  %p844_p1 = scmp.lt.s32.totalorder %s842_s17, %s838_s15 }
  0x22   : > { %289 = vmatpush.msra.mxu0 %v233_v5  ;;  %732 = vmatpush.msra.mxu3 %v233_v5  ;;  %p840_p12 = pnand %p839_p11, %p954_p5  ;;  %p845_p2 = por %p844_p1, %p843_p0 }
  0x24   : > { %290 = vmatpush.msra.mxu0 %v232_v6  ;;  %733 = vmatpush.msra.mxu3 %v232_v6  ;;  %p841_p13 = pneg %p840_p12 }
  0x26   : > { %291 = vmatpush.msra.mxu0 %v231_v7  ;;  %734 = vmatpush.msra.mxu3 %v231_v7  ;;  %p846_p3 = pnand %p845_p2, %p841_p13 }
  0x28   : > { %292 = vmatpush.msra.mxu0 %v230_v8  ;;  %735 = vmatpush.msra.mxu3 %v230_v8 }
  0x2a   : > { %293 = vmatpush.msra.mxu0 %v229_v9  ;;  %736 = vmatpush.msra.mxu3 %v229_v9 }
  0x2c   : > { %294 = vmatpush.msra.mxu0 %v228_v10  ;;  %737 = vmatpush.msra.mxu3 %v228_v10 }
  0x2e   : > { %295 = vmatpush.msra.mxu0 %v227_v11  ;;  %738 = vmatpush.msra.mxu3 %v227_v11 }
  0x30   : > { %296 = vmatpush.msra.mxu0 %v226_v12  ;;  %739 = vmatpush.msra.mxu3 %v226_v12 }
  0x32   : > { %297 = vmatpush.msra.mxu0 %v225_v13  ;;  %740 = vmatpush.msra.mxu3 %v225_v13 }
  0x34   : > { %298 = vmatpush.msra.mxu0 %v224_v14  ;;  %741 = vmatpush.msra.mxu3 %v224_v14 }
  0x36   : > { %299 = vmatpush.msra.mxu0 %v223_v15  ;;  %742 = vmatpush.msra.mxu3 %v223_v15 }
  0x37   : > { %686 = vmatmul.msk.f32.vlgmr.msra.gmra.mxu0 %vm249_vm1, %v239_v16  ;;  %691 = vmatmul.msk.f32.vlgmr.msra.gmra.mxu3 %vm249_vm1, %v244_v52 }
  0x3f   : > { %687 = vmatmul.msk.f32.gmra.mxu0 %vm249_vm1, %v240_v17  ;;  %692 = vmatmul.msk.f32.gmra.mxu3 %vm249_vm1, %v245_v57 }
  0x47   : > { %688 = vmatmul.msk.f32.gmra.mxu0 %vm249_vm1, %v241_v18  ;;  %693 = vmatmul.msk.f32.gmra.mxu3 %vm249_vm1, %v246_v58 }
  0x4f   : > { %689 = vmatmul.msk.f32.gmra.mxu0 %vm249_vm1, %v242_v19  ;;  %694 = vmatmul.msk.f32.gmra.mxu3 %vm249_vm1, %v247_v59 }
  0x57   : > { %690 = vmatmul.msk.f32.gmra.mxu0 %vm249_vm1, %v243_v20  ;;  %695 = vmatmul.msk.f32.gmra.mxu3 %vm249_vm1, %v248_v60 }
  0xb4   : > { %v301_v21 = vpop.f32.mrf.mxu0 }
  0xb5   : > { %v341_v31 = vmin.f32 %v301_v21, 0.0  ;;  %vm331_vm6 = vcmp.gt.f32.partialorder %v301_v21, 0.0 }
  0xb7   : > { %v351_v35 = vmul.f32 1.442695, %v341_v31 }
  0xba   : > { %v1055_v12 = vpop.f32.mrf.mxu3 }
  0xbb   : > { %vm336_vm13 = vcmp.gt.f32.partialorder %v1055_v12, 0.0 }
  0xbc   : > { %v304_v22 = vpop.f32.mrf.mxu0 }
  0xbd   : > { %v342_v27 = vmin.f32 %v304_v22, 0.0  ;;  %vm332_vm5 = vcmp.gt.f32.partialorder %v304_v22, 0.0 }
  0xbf   : > { %v353_v33 = vmul.f32 1.442695, %v342_v27 }
  0xc2   : > { %v1057_v13 = vpop.f32.mrf.mxu3 }
  0xc3   : > { %vm337_vm12 = vcmp.gt.f32.partialorder %v1057_v13, 0.0 }
  0xc4   : > { %v307_v23 = vpop.f32.mrf.mxu0 }
  0xc5   : > { %v343_v26 = vmin.f32 %v307_v23, 0.0  ;;  %vm333_vm4 = vcmp.gt.f32.partialorder %v307_v23, 0.0 }
  0xc7   : > { %v355_v29 = vmul.f32 1.442695, %v343_v26 }
  0xca   : > { %v322_v14 = vpop.f32.mrf.mxu3 }
  0xcb   : > { %vm338_vm11 = vcmp.gt.f32.partialorder %v322_v14, 0.0 }
  0xcc   : > { %v310_v24 = vpop.f32.mrf.mxu0 }
  0xcd   : > { %v344_v25 = vmin.f32 %v310_v24, 0.0  ;;  %vm334_vm3 = vcmp.gt.f32.partialorder %v310_v24, 0.0 }
  0xcf   : > { %v357_v28 = vmul.f32 1.442695, %v344_v25 }
  0xd1   : > { %782 = vpow2.f32 %v357_v28 }
  0xd2   : > { %784 = vpow2.f32 %v355_v29  ;;  %v325_v18 = vpop.f32.mrf.mxu3  ;;  %v347_v29 = vmin.f32 %v1057_v13, 0.0 }
  0xd3   : > { %v349_v19 = vmin.f32 %v325_v18, 0.0  ;;  %vm339_vm10 = vcmp.gt.f32.partialorder %v325_v18, 0.0 }
  0xd4   : > { %v313_v30 = vpop.f32.mrf.mxu0 }
  0xd5   : > { %v345_v32 = vmin.f32 %v313_v30, 0.0  ;;  %vm335_vm2 = vcmp.gt.f32.partialorder %v313_v30, 0.0 }
  0xd7   : > { %v359_v34 = vmul.f32 1.442695, %v345_v32  ;;  %v783_v36 = vpop.eup %782 }
  0xd8   : > { %v785_v37 = vpop.eup %784  ;;  %v699_v40 = vadd.f32 -1.0, %v783_v36 }
  0xd9   : > { %786 = vpow2.f32 %v359_v34  ;;  %v698_v43 = vadd.f32 -1.0, %v785_v37  ;;  %v346_v34 = vmin.f32 %v1055_v12, 0.0 }
  0xda   : > { %788 = vpow2.f32 %v353_v33  ;;  %v384_v45 = vsel %vm334_vm3, %v310_v24, %v699_v40  ;;  %v328_v26 = vpop.f32.mrf.mxu3 }
  0xdb   : > { %790 = vpow2.f32 %v351_v35  ;;  %v383_v47 = vsel %vm333_vm4, %v307_v23, %v698_v43  ;;  %v367_v23 = vmul.f32 1.442695, %v349_v19  ;;  %v350_v28 = vmin.f32 %v328_v26, 0.0 }
  0xdc   : > { %v363_v35 = vmul.f32 1.442695, %v347_v29  ;;  %vm340_vm9 = vcmp.gt.f32.partialorder %v328_v26, 0.0 }
  0xdd   : > { %v369_v31 = vmul.f32 1.442695, %v350_v28  ;;  %v569_v28 = vld [vmem:[%s1139_s3 + $0x8] sm:$0xff] }
  0xdf   : > { %v787_v38 = vpop.eup %786 }
  0xe0   : > { %v700_v39 = vadd.f32 -1.0, %v787_v38  ;;  %v789_v41 = vpop.eup %788 }
  0xe1   : > { %v791_v44 = vpop.eup %790  ;;  %v697_v46 = vadd.f32 -1.0, %v789_v41  ;;  %v361_v41 = vmul.f32 1.442695, %v346_v34 }
  0xe2   : > { %v385_v42 = vsel %vm335_vm2, %v313_v30, %v700_v39  ;;  %v696_v48 = vadd.f32 -1.0, %v791_v44 }
  0xe3   : > { %423 = vmatpush.msra.mxu1 %v385_v42  ;;  %v382_v49 = vsel %vm332_vm5, %v304_v22, %v697_v46  ;;  %v348_v22 = vmin.f32 %v322_v14, 0.0 }
  0xe4   : > { %v381_v51 = vsel %vm331_vm6, %v301_v21, %v696_v48 }
  0xe5   : > { %424 = vmatpush.msra.mxu1 %v384_v45  ;;  %v365_v30 = vmul.f32 1.442695, %v348_v22  ;;  %v572_v22 = vld [vmem:[%s1139_s3 + $0x20] sm:$0xff] }
  0xe7   : > { %425 = vmatpush.msra.mxu1 %v383_v47 }
  0xe9   : > { %426 = vmatpush.msra.mxu1 %v382_v49 }
  0xeb   : > { %427 = vmatpush.msra.mxu1 %v381_v51 }
  0xec   : > { %706 = vmatmul.msk.f32.vlgmr.msra.gmra.mxu1 %vm396_vm7, %v391_v50 }
  0xf4   : > { %707 = vmatmul.msk.f32.gmra.mxu1 %vm396_vm7, %v392_v53 }
  0xfc   : > { %708 = vmatmul.msk.f32.gmra.mxu1 %vm396_vm7, %v393_v54 }
 0x104   : > { %709 = vmatmul.msk.f32.gmra.mxu1 %vm396_vm7, %v394_v55 }
 0x10c   : > { %710 = vmatmul.msk.f32.gmra.mxu1 %vm396_vm7, %v395_v56 }
 0x169   : > { %v429_v61 = vpop.f32.mrf.mxu1 }
 0x16a   : > { %v444_v62 = vmul.f32 0.15811388, %v429_v61 }
 0x16c   : > { %v450_v63 = vsel %vm449_vm8, %v444_v62, -inf }
 0x16d   : > { %451 = vmax.xlane.f32.xlu0 %v450_v63 }
 0x171   : > { %v432_v0 = vpop.f32.mrf.mxu1 }
 0x172   : > { %v445_v1 = vmul.f32 0.15811388, %v432_v0 }
 0x174   : > { %v453_v2 = vsel %vm449_vm8, %v445_v1, -inf }
 0x175   : > { %454 = vmax.xlane.f32.xlu0 %v453_v2 }
 0x179   : > { %v435_v3 = vpop.f32.mrf.mxu1 }
 0x17a   : > { %v446_v4 = vmul.f32 0.15811388, %v435_v3 }
 0x17c   : > { %v456_v5 = vsel %vm449_vm8, %v446_v4, -inf }
 0x17d   : > { %457 = vmax.xlane.f32.xlu1 %v456_v5 }
 0x181   : > { %v438_v6 = vpop.f32.mrf.mxu1 }
 0x182   : > { %v447_v7 = vmul.f32 0.15811388, %v438_v6 }
 0x184   : > { %v459_v8 = vsel %vm449_vm8, %v447_v7, -inf }
 0x185   : > { %460 = vmax.xlane.f32.xlu1 %v459_v8 }
 0x189   : > { %v441_v9 = vpop.f32.mrf.mxu1 }
 0x18a   : > { %v1051_v10 = vmul.f32 0.15811388, %v441_v9 }
 0x18c   : > { %v462_v11 = vsel %vm449_vm8, %v1051_v10, -inf }
 0x18d   : > { %463 = vmax.xlane.f32.xlu2 %v462_v11 }
 0x1e0   : > { %v452_v15 = vpop.xlane.xlu0 %451 }
 0x1e1   : > { %v465_v16 = vsub.f32 %v444_v62, %v452_v15 }
 0x1e3   : > { %v470_v17 = vmul.f32 1.442695, %v465_v16 }
 0x1e5   : > { %792 = vpow2.f32 %v470_v17 }
 0x1e8   : > { %v455_v20 = vpop.xlane.xlu0 %454 }
 0x1e9   : > { %v466_v21 = vsub.f32 %v445_v1, %v455_v20 }
 0x1eb   : > { %v1059_v24 = vpop.eup %792  ;;  %v472_v25 = vmul.f32 1.442695, %v466_v21 }
 0x1ec   : > { %v480_v27 = vsel %vm449_vm8, %v1059_v24, 0.0 }
 0x1ed   : > { %794 = vpow2.f32 %v472_v25  ;;  %481 = vadd.xlane.f32.xlu2 %v480_v27 }
 0x1ee   : > { %796 = vpow2.f32 %v367_v23  ;;  %v571_v23 = vld [vmem:[%s1139_s3 + $0x18] sm:$0xff] }
 0x1ef   : > { %798 = vpow2.f32 %v369_v31 }
 0x1f0   : > { %v458_v32 = vpop.xlane.xlu1 %457  ;;  %800 = vpow2.f32 %v365_v30  ;;  %v568_v30 = vld [vmem:[%s1139_s3] sm:$0xff] }
 0x1f1   : > { %v467_v33 = vsub.f32 %v446_v4, %v458_v32 }
 0x1f3   : > { %v795_v36 = vpop.eup %794  ;;  %v474_v37 = vmul.f32 1.442695, %v467_v33  ;;  %v567_v33 = vld [vmem:[%s1140_s4] sm:$0xf] }
 0x1f4   : > { %v797_v38 = vpop.eup %796  ;;  %v483_v39 = vsel %vm449_vm8, %v795_v36, 0.0 }
 0x1f5   : > { %802 = vpow2.f32 %v474_v37  ;;  %484 = vadd.xlane.f32.xlu0 %v483_v39  ;;  %v799_v40 = vpop.eup %798  ;;  %v704_v43 = vadd.f32 -1.0, %v797_v38 }
 0x1f6   : > { %804 = vpow2.f32 %v363_v35  ;;  %v705_v42 = vadd.f32 -1.0, %v799_v40  ;;  %v801_v44 = vpop.eup %800 }
 0x1f7   : > { %806 = vpow2.f32 %v361_v41  ;;  %v389_v50 = vsel %vm339_vm10, %v325_v18, %v704_v43  ;;  %v703_v51 = vadd.f32 -1.0, %v801_v44 }
 0x1f8   : > { %v461_v45 = vpop.xlane.xlu1 %460  ;;  %v390_v47 = vsel %vm340_vm9, %v328_v26, %v705_v42  ;;  %v570_v26 = vld [vmem:[%s1139_s3 + $0x10] sm:$0xff] }
 0x1f9   : > { %v468_v46 = vsub.f32 %v447_v7, %v461_v45  ;;  %711 = vmatpush.xpose.msk.msra.mxu2 %vm449_vm8, %v390_v47  ;;  %v388_v54 = vsel %vm338_vm11, %v322_v14, %v703_v51 }
 0x1fb   : > { %v803_v48 = vpop.eup %802  ;;  %v476_v49 = vmul.f32 1.442695, %v468_v46 }
 0x1fc   : > { %v805_v52 = vpop.eup %804  ;;  %v486_v53 = vsel %vm449_vm8, %v803_v48, 0.0 }
 0x1fd   : > { %808 = vpow2.f32 %v476_v49  ;;  %487 = vadd.xlane.f32.xlu1 %v486_v53  ;;  %712 = vmatpush.xpose.msk.msra.mxu2 %vm449_vm8, %v389_v50  ;;  %v702_v55 = vadd.f32 -1.0, %v805_v52  ;;  %v807_v56 = vpop.eup %806 }
 0x1fe   : > { %v701_v62 = vadd.f32 -1.0, %v807_v56 }
 0x1ff   : > { %v387_v61 = vsel %vm337_vm12, %v1057_v13, %v702_v55 }
 0x200   : > { %v464_v57 = vpop.xlane.xlu2 %463  ;;  %v386_v0 = vsel %vm336_vm13, %v1055_v12, %v701_v62 }
 0x201   : > { %v469_v58 = vsub.f32 %v1051_v10, %v464_v57  ;;  %713 = vmatpush.xpose.msk.msra.mxu2 %vm449_vm8, %v388_v54 }
 0x203   : > { %v809_v59 = vpop.eup %808  ;;  %v478_v60 = vmul.f32 1.442695, %v469_v58 }
 0x204   : > { %v489_v63 = vsel %vm449_vm8, %v809_v59, 0.0 }
 0x205   : > { %810 = vpow2.f32 %v478_v60  ;;  %490 = vadd.xlane.f32.xlu2 %v489_v63  ;;  %714 = vmatpush.xpose.msk.msra.mxu2 %vm449_vm8, %v387_v61 }
 0x209   : > { %715 = vmatpush.xpose.msk.msra.mxu2 %vm449_vm8, %v386_v0 }
 0x20b   : > { %v811_v1 = vpop.eup %810 }
 0x20c   : > { %v492_v2 = vsel %vm449_vm8, %v811_v1, 0.0 }
 0x20d   : > { %493 = vadd.xlane.f32.xlu0 %v492_v2 }
 0x260   : > { %v482_v3 = vpop.xlane.xlu2 %481 }
 0x261   : > { %812 = vrcp.f32 %v482_v3 }
 0x267   : > { %v813_v4 = vpop.eup %812 }
 0x268   : > { %v485_v5 = vpop.xlane.xlu0 %484  ;;  %v500_v6 = vmul.f32 %v813_v4, %v1059_v24 }
 0x269   : > { %814 = vrcp.f32 %v485_v5 }
 0x26a   : > { %716 = vmatmul.msk.f32.vlgmr.msra.gmra.mxu2 %vm449_vm8, %v500_v6 }
 0x26f   : > { %v815_v7 = vpop.eup %814 }
 0x270   : > { %v488_v8 = vpop.xlane.xlu1 %487  ;;  %v501_v9 = vmul.f32 %v815_v7, %v795_v36 }
 0x271   : > { %816 = vrcp.f32 %v488_v8 }
 0x272   : > { %717 = vmatmul.msk.f32.gmra.mxu2 %vm449_vm8, %v501_v9 }
 0x277   : > { %v817_v10 = vpop.eup %816 }
 0x278   : > { %v491_v11 = vpop.xlane.xlu2 %490  ;;  %v502_v12 = vmul.f32 %v817_v10, %v803_v48 }
 0x279   : > { %818 = vrcp.f32 %v491_v11 }
 0x27a   : > { %718 = vmatmul.msk.f32.gmra.mxu2 %vm449_vm8, %v502_v12 }
 0x27f   : > { %v819_v13 = vpop.eup %818 }
 0x280   : > { %v494_v14 = vpop.xlane.xlu0 %493  ;;  %v503_v15 = vmul.f32 %v819_v13, %v809_v59 }
 0x281   : > { %820 = vrcp.f32 %v494_v14 }
 0x282   : > { %719 = vmatmul.msk.f32.gmra.mxu2 %vm449_vm8, %v503_v15 }
 0x287   : > { %v821_v16 = vpop.eup %820 }
 0x288   : > { %v504_v17 = vmul.f32 %v821_v16, %v811_v1 }
 0x28a   : > { %720 = vmatmul.msk.f32.gmra.mxu2 %vm449_vm8, %v504_v17 }
 0x2ed   : > { %v552_v18 = vpop.f32.mrf.mxu2 }
 0x2ee   : > { %v573_v32 = vmul.f32 %v568_v30, %v552_v18 }
 0x2f5   : > { %v555_v19 = vpop.f32.mrf.mxu2 }
 0x2f6   : > { %v574_v31 = vmul.f32 %v569_v28, %v555_v19 }
 0x2fd   : > { %v558_v20 = vpop.f32.mrf.mxu2 }
 0x2fe   : > { %v575_v29 = vmul.f32 %v570_v26, %v558_v20 }
 0x305   : > { %v561_v21 = vpop.f32.mrf.mxu2 }
 0x306   : > { %v576_v27 = vmul.f32 %v571_v23, %v561_v21 }
 0x30d   : > { %v564_v24 = vpop.f32.mrf.mxu2 }
 0x30e   : > { %v577_v25 = vmul.f32 %v572_v22, %v564_v24 }
 0x310   : > { %592 = vmatpush.msrb.mxu1 %v577_v25 }
 0x312   : > { %593 = vmatpush.msrb.mxu1 %v576_v27 }
 0x314   : > { %594 = vmatpush.msrb.mxu1 %v575_v29 }
 0x316   : > { %595 = vmatpush.msrb.mxu1 %v574_v31 }
 0x318   : > { %596 = vmatpush.msrb.mxu1 %v573_v32 }
 0x319   : > { %721 = vmatmul.msk.f32.vlgmr.msrb.gmra.mxu1 %vm396_vm7, %v567_v33 }
 0x396   : > { %v598_v34 = vpop.f32.mrf.mxu1 }
 0x397   : > { %602 = vst.msk [vmem:[%s217_s10] sm:$0xf] %vm601_vm14, %v598_v34 }
 0x398   : > { %849 = shalt.err (!%p846_p3)
}
 0x399   : > { %743 = dma.vmem_to_hbm [thread:$0]  (%p954_p5), %s617_s11, 64, %s619_s12, %s604_s13  }
 0x39a PF: > { %p749_p4 = scmp.ge.s32.totalorder %s884_s21, 2  ;;  %s630_s26 = sand.u32 1, %s872_s18  }
 0x39b   : > { %s631_s30 = scalar_lea.sflag [#allocation3], %s630_s26 }
 0x39c   : > { %p746_p7 = pnand %p749_p4, %p958_p6 }
 0x39e   : > { %p747_p8 = pneg %p746_p7 }
 0x3a0   : > { %867 = dma.done.wait (%p747_p8), %s631_s30, 64  }
 0x3a1   : > { %869 = vsyncadd (%p747_p8), %s631_s30, 4294967232  ;;  %p15_p9 = scmp.ge.s32.totalorder %s941_s24, 4   ;;  %s1144_s18 = smov %s876_s19 }
 0x3a2   : > { %s1145_s19 = smov %s880_s20  ;;  %s1146_s20 = smov %s952_s27 }
 0x3a3   : > { %s1147_s21 = smov %s941_s24  ;;  %17 = sbr.rel (!%p15_p9) target bundleno = 3 (0x3), region = 75 }
 0x3a8   :  { %637 = vsyncpa [#allocation3], 1 }
 0x3a9   :  { %639 = vsyncpa [#allocation3 + $0x1], 1 }

</bundles_post_ra>
